<compile_context>
chip_gen: v7x
topology: tpu7x:2x2x1
jax: 0.10.0
libtpu: 0.0.40
codegen_flags: <defaults>
</compile_context>

<pallas_src>
import jax
import jax.numpy as jnp
from jax import lax
from jax.experimental import pallas as pl
from jax.experimental.pallas import tpu as pltpu


def _sr_matcher_kernel(wt_ref, qt_ref, out_ref):
    """One (batch, seq-tile) grid step of the transposed SR_Matcher matmul.

    wt_ref : (1, V, D)   folded per-batch weights  W^T[b] = role[b] @ matrix^T
    qt_ref : (1, D, TS)  transposed token features (lane axis = sequence)
    out_ref: (1, V, TS)  transposed role scores for this tile
    """
    scores = jnp.dot(wt_ref[0], qt_ref[0],
                     preferred_element_type=jnp.float32)          # (V, TS)
    # Role index 1 is hard-spliced to exact zero in the reference module
    # (torch.cat with a zeros tensor); a select keeps that exact even if the
    # inputs contain +/-inf or NaN.
    keep = lax.broadcasted_iota(jnp.int32, scores.shape, 0) != 1
    out_ref[0] = jnp.where(keep, scores, 0.0).astype(out_ref.dtype)


def sr_matcher_forward(role_vectors, pretrained_emb, word_id_emb, matrix,
                       *, seq_tile=512, stream_dtype=jnp.float32):
    """Pallas implementation of SR_Matcher.forward.

    role_vectors   : (B, V*200) or (B, V, 200) float32
    pretrained_emb : (B, S, P) float32
    word_id_emb    : (B, S, FE) float32
    matrix         : (P+FE, 200) float32
    returns        : (B*S, V) float32
    """
    B, S, P = pretrained_emb.shape
    FE = word_id_emb.shape[2]
    D = P + FE
    assert matrix.shape == (D, 200), matrix.shape

    role = role_vectors.reshape(B, -1, 200)
    V = role.shape[1]

    # ---- per-batch weight fold (XLA, once per call) -------------------------
    # W^T[b] = role[b] @ matrix^T : a 200-wide contraction over only B*V rows,
    # cheap next to the token matmul and it shrinks the operand the kernel
    # streams per batch from (V, 200) to (V, D).
    w_t = jnp.einsum("bvk,dk->bvd", role, matrix,
                     preferred_element_type=jnp.float32)           # (B, V, D)

    # ---- lane-dense input layout (wrapper-side plumbing) ---------------------
    # Concat + transpose so the big axis S sits on the lane dimension and the
    # kernel issues ONE merged matmul per tile instead of two tiny-K dots.
    q_t = jnp.concatenate([pretrained_emb, word_id_emb], axis=2)   # (B, S, D)
    q_t = jnp.transpose(q_t, (0, 2, 1))                            # (B, D, S)

    q_t = q_t.astype(stream_dtype)
    w_t = w_t.astype(stream_dtype)

    # ---- generation-aware seq tile / VMEM budget -----------------------------
    try:
        vmem_cap = int(pltpu.get_tpu_info().vmem_capacity_bytes)
    except Exception:                       # interpret mode / unknown chip
        vmem_cap = 64 << 20                 # conservative: v7x has 64 MiB / TC
    budget = int(vmem_cap * 0.6)

    itm = jnp.dtype(stream_dtype).itemsize

    def footprint(ts):
        # double-buffered weight / input / output blocks for one grid step
        return 2 * (V * D * itm + D * ts * itm + V * ts * 4)

    if S <= seq_tile:
        TS = S                              # block dim == full array dim: legal
    else:
        TS = max(128, (seq_tile // 128) * 128)
        while TS > 128 and footprint(TS) > budget:
            TS //= 2
    grid = (B, pl.cdiv(S, TS))

    vmem_limit = int(min(max(footprint(TS) + (4 << 20), 16 << 20),
                         int(vmem_cap * 0.75)))

    flops = 2 * B * V * D * S
    bytes_accessed = int(itm * (B * D * S + B * V * D) + 4 * B * V * S)

    out_t = pl.pallas_call(
        _sr_matcher_kernel,
        out_shape=jax.ShapeDtypeStruct((B, V, S), jnp.float32),
        grid_spec=pltpu.PrefetchScalarGridSpec(
            num_scalar_prefetch=0,
            grid=grid,
            in_specs=[
                pl.BlockSpec((1, V, D), lambda b, s: (b, 0, 0)),    # W^T[b]
                pl.BlockSpec((1, D, TS), lambda b, s: (b, 0, s)),   # Q^T tile
            ],
            out_specs=pl.BlockSpec((1, V, TS), lambda b, s: (b, 0, s)),
        ),
        compiler_params=pltpu.CompilerParams(
            # no cross-step carry -> both axes independent (megacore on v7x)
            dimension_semantics=("parallel", "parallel"),
            vmem_limit_bytes=vmem_limit,
        ),
        cost_estimate=pl.CostEstimate(
            flops=flops, transcendentals=0, bytes_accessed=bytes_accessed),
    )(w_t, q_t)

    # back to the module's (B*S, V) layout
    return jnp.transpose(out_t, (0, 2, 1)).reshape(B * S, V)


def _reference_forward(role_vectors, pretrained_emb, word_id_emb, matrix):
    """Pure-JAX reference mirroring the PyTorch forward literally."""
    B, S, _ = pretrained_emb.shape
    role = role_vectors.reshape(B, -1, 200)
    V = role.shape[1]
    q = jnp.concatenate([pretrained_emb, word_id_emb], axis=2)          # (B,S,D)
    q_exp = jnp.broadcast_to(q[:, :, None, :], (B, S, V, q.shape[2]))   # (B,S,V,D)
    y = q_exp.reshape(B * S * V, -1) @ matrix                            # (BSV,200)
    y = y.reshape(B, S, V, 200)
    role_exp = jnp.broadcast_to(role[:, None, :, :], (B, S, V, 200))
    scores = jnp.sum(role_exp * y, axis=3)                               # (B,S,V)
    zeros = jnp.zeros((B, S, 1), jnp.float32)
    out = jnp.concatenate([scores[:, :, 0:1], zeros, scores[:, :, 2:]], axis=2)
    return out.reshape(B * S, V)


if __name__ == "__main__":
    # Small synthetic config consistent with the module:
    #   batch_size=2, seq_len=8, target_vocab_size=8,
    #   pretrain_emb_size=16, flag_embedding_size=16  -> D=32, role dim = 200.
    B, S, V = 2, 8, 8
    pretrain_emb_size, flag_emb_size = 16, 16
    D = pretrain_emb_size + flag_emb_size

    key = jax.random.PRNGKey(0)
    k1, k2, k3, k4 = jax.random.split(key, 4)

    pretrained_emb = jax.random.normal(k1, (B, S, pretrain_emb_size), jnp.float32)
    word_id_emb = jax.random.normal(k2, (B, S, flag_emb_size), jnp.float32)
    role_vectors = jax.random.normal(k3, (B, V * 200), jnp.float32)
    # Module __init__ uses zeros for `matrix`; deterministic random values here
    # so the kernel exercises a non-trivial compute path.
    matrix = 0.1 * jax.random.normal(k4, (D, 200), jnp.float32)

    ref = _reference_forward(role_vectors, pretrained_emb, word_id_emb, matrix)

    # f32 path: exact-semantics check against the literal reference.
    out = sr_matcher_forward(role_vectors, pretrained_emb, word_id_emb, matrix)
    out = jax.block_until_ready(out)
    assert out.shape == (B * S, V), out.shape
    assert jnp.all(out[:, 1] == 0.0), "column 1 must be exactly zero"
    assert jnp.allclose(out, ref, atol=1e-3, rtol=1e-4), "mismatch vs reference"

    # bf16-streaming path (production HBM-bound config): compile/run coverage
    # with a loose numeric check (f32 MXU accumulation, bf16 operand rounding).
    out_bf16 = sr_matcher_forward(role_vectors, pretrained_emb, word_id_emb,
                                  matrix, stream_dtype=jnp.bfloat16)
    out_bf16 = jax.block_until_ready(out_bf16)
    scale = float(jnp.max(jnp.abs(ref))) + 1e-6
    assert float(jnp.max(jnp.abs(out_bf16 - ref))) < 0.05 * scale, "bf16 path off"

    # Note: nn.Dropout(p=0.0) is an identity in the forward pass and is omitted.
    print("KERNEL_OK")
</pallas_src>

<mosaic_0001>
module attributes {stable_mosaic.version = 11 : i64} {
  func.func @_sr_matcher_kernel(%arg0: i32, %arg1: i32, %arg2: memref<1x8x32xf32, #tpu.memory_space<vmem>>, %arg3: memref<1x32x8xf32, #tpu.memory_space<vmem>>, %arg4: memref<1x8x8xf32, #tpu.memory_space<vmem>>) attributes {dimension_semantics = [#tpu.dimension_semantics<parallel>, #tpu.dimension_semantics<parallel>], iteration_bounds = array<i64: 2, 1>, scalar_prefetch = 0 : i64, scratch_operands = 0 : i64, tpu.core_type = #tpu.core_type<tc>, window_params = [{transform_indices = @transform_0, window_bounds = array<i64: 1, 8, 32>}, {transform_indices = @transform_1, window_bounds = array<i64: 1, 32, 8>}, {transform_indices = @transform_2, window_bounds = array<i64: 1, 8, 8>}]} {
    %c0 = arith.constant 0 : index
    %c0_0 = arith.constant 0 : index
    %c0_1 = arith.constant 0 : index
    %0 = vector.load %arg2[%c0, %c0_0, %c0_1] : memref<1x8x32xf32, #tpu.memory_space<vmem>>, vector<1x8x32xf32>
    %1 = vector.shape_cast %0 : vector<1x8x32xf32> to vector<8x32xf32>
    %c0_2 = arith.constant 0 : index
    %c0_3 = arith.constant 0 : index
    %c0_4 = arith.constant 0 : index
    %2 = vector.load %arg3[%c0_2, %c0_3, %c0_4] : memref<1x32x8xf32, #tpu.memory_space<vmem>>, vector<1x32x8xf32>
    %3 = vector.shape_cast %2 : vector<1x32x8xf32> to vector<32x8xf32>
    %cst = arith.constant dense<0.000000e+00> : vector<8x8xf32>
    %4 = tpu.matmul %1, %3, %cst {dimension_numbers = #tpu.dot_dimension_numbers<[1], [0], [0], [1], [0, 0, 1, 1], [], []>} : vector<8x32xf32>, vector<32x8xf32>, vector<8x8xf32> -> vector<8x8xf32>
    %5 = tpu.iota {dimensions = array<i32: 0>} : vector<8x8xi32>
    %c1_i32 = arith.constant 1 : i32
    %6 = vector.broadcast %c1_i32 : i32 to vector<8x8xi32>
    %7 = arith.cmpi ne, %5, %6 : vector<8x8xi32>
    %cst_5 = arith.constant 0.000000e+00 : f32
    %8 = vector.broadcast %cst_5 : f32 to vector<8x8xf32>
    %9 = arith.select %7, %4, %8 : vector<8x8xi1>, vector<8x8xf32>
    %c0_6 = arith.constant 0 : index
    %c0_7 = arith.constant 0 : index
    %c0_8 = arith.constant 0 : index
    %10 = vector.load %arg4[%c0_6, %c0_7, %c0_8] : memref<1x8x8xf32, #tpu.memory_space<vmem>>, vector<1x8x8xf32>
    %11 = vector.shape_cast %10 : vector<1x8x8xf32> to vector<8x8xf32>
    %12 = vector.shape_cast %9 : vector<8x8xf32> to vector<1x8x8xf32>
    tpu.vector_store %arg4[%c0_6, %c0_7, %c0_8], %12 {strides = array<i32>} : memref<1x8x8xf32, #tpu.memory_space<vmem>>, vector<1x8x8xf32>,
    return
  }
  func.func @transform_0(%arg0: i32, %arg1: i32) -> (i32, i32, i32) {
    %c0_i32 = arith.constant 0 : i32
    %c0_i32_0 = arith.constant 0 : i32
    %c0_i32_1 = arith.constant 0 : i32
    return %arg0, %c0_i32, %c0_i32_0 : i32, i32, i32
  }
  func.func @transform_1(%arg0: i32, %arg1: i32) -> (i32, i32, i32) {
    %c0_i32 = arith.constant 0 : i32
    %c0_i32_0 = arith.constant 0 : i32
    return %arg0, %c0_i32, %arg1 : i32, i32, i32
  }
  func.func @transform_2(%arg0: i32, %arg1: i32) -> (i32, i32, i32) {
    %c0_i32 = arith.constant 0 : i32
    %c0_i32_0 = arith.constant 0 : i32
    return %arg0, %c0_i32, %arg1 : i32, i32, i32
  }
}

</mosaic_0001>

<bundles_post_ra>
// kernel: tpu_custom_call.1
= control target key start
LH: loop header
LB: loop body
LE: loop exit
PB: predicated region body
PF: predicated region fallthrough
CT: control target
= control target key end

     0   :  { %7 = vsyncpa [#allocation3], 0  ;;  %s679_s0 = inlined_call_operand.vmem [shape: f32[2,8,32], index: 0, kind: input, shape index: {}]   ;;  %s680_s1 = inlined_call_operand.vmem [shape: f32[2,32,8], index: 1, kind: input, shape index: {}]   ;;  %s681_s2 = inlined_call_operand.hbm [shape: f32[2,8,8], index: 2, kind: output, shape index: {}]  }
   0x1   :  { %9 = vsyncpa [#allocation3 + $0x1], 0  ;;  %s564_s9 = smov 0   ;;  %s566_s10 = smov 0  }
   0x2   :  { %s568_s11 = smov 0   ;;  %s570_s12 = smov 0  }
   0x3   :  { %s572_s13 = smov 0   ;;  %s574_s14 = smov 0  }
   0x4 LB: > { %s370_s15 = sadd.s32 4294967295, %s543_s14   ;;  %s371_s16 = sadd.s32 4294967294, %s543_s14   ;;  %s543_s14 = sphi %s574_s14, %s15_s14   ;;  %s539_s13 = sphi %s572_s13, %s688_s13   ;;  %s535_s12 = sphi %s570_s12, %s687_s12   ;;  %s531_s11 = sphi %s568_s11, %s686_s11   ;;  %s527_s10 = sphi %s566_s10, %s685_s10   ;;  %s523_s9 = sphi %s564_s9, %s684_s9  }
   0x5   : > { %s27_s17 = sadd.s32 1, %s539_s13  ;;  %s90_s18 = sadd.s32 1, %s531_s11 }
   0x6   : > { %p29_p0 = scmp.ge.s32.totalorder %s27_s17, 2  ;;  %p100_p1 = scmp.ne.s32.totalorder %s531_s11, %s527_s10 }
   0x7   : > { %p101_p2 = scmp.eq.s32.totalorder %s370_s15, 1  ;;  %p106_p3 = scmp.ne.s32.totalorder %s527_s10, %s523_s9 }
   0x8   : > { %s690_s17 = smov (%p29_p0, %s27_s17), 0  ;;  %p107_p5 = scmp.eq.s32.totalorder %s371_s16, 1 }
   0x9   : > { %p604_p4 = por %p101_p2, %p100_p1  ;;  %s85_s20 = ssub.s32 %s539_s13, %s690_s17 }
   0xa   : > { %p374_p6 = scmp.ge.s32.totalorder %s543_s14, 1  ;;  %p88_p7 = scmp.eq.s32.totalorder %s85_s20, 0 }
   0xb   : > { %p611_p8 = por %p107_p5, %p106_p3  ;;  %p143_p9 = scmp.lt.s32.totalorder %s543_s14, 3 }
   0xc   : > { %s617_s22 = scalar_select %p88_p7, %s531_s11, %s90_s18  }
   0xd   : > { %p144_p10 = pnand %p374_p6, %p143_p9 }
   0xe   : > { %p172_p11 = scmp.lt.s32.totalorder (!%p144_p10), %s535_s12, 1  ;;  %v545_v0 = vmov (!%p144_p10), 0.0|0.0   ;;  %vm546_vm0 = vmmov (!%p144_p10), 0   ;;  %v547_v1 = vmov (!%p144_p10), 0.0   ;;  %vm189_vm1 = vcmask (!%p144_p10), 261120   ;;  %s169_s4 = sand.u32 (!%p144_p10), 1, %s527_s10  }
   0xf   : > { %147 = sbr.rel (%p144_p10) target bundleno = 263 (0x107), region = 28  ;;  %401 = vmatprep.subr.bf16.mxu0 (!%p144_p10), %v545_v0  ;;  %398 = vmatprep.mubr.msk.f32.mxu0 (!%p144_p10), %vm546_vm0, %v547_v1  ;;  %v263_v9 = vlaneseq (!%p144_p10)  ;;  %s375_s5 = sshll.u32 (!%p144_p10), %s169_s4, 3  ;;  %vm267_vm3 = vcmask (!%p144_p10), 64512  }
  0x10   : > { %s381_s6 = sshll.u32 (!%p144_p10), %s535_s12, 7  ;;  %s171_s7 = scalar_lea.vmem (!%p144_p10), [#allocation2], %s375_s5 }
  0x11   : > { %v264_v10 = vshrl.u32 (!%p144_p10), %v263_v9, 7  ;;  %s284_s8 = sshll.u32 (!%p144_p10), %s171_s7, 4  ;;  %s632_s18 = scalar_lea.hbm (!%p144_p10), %s681_s2, %s381_s6  ;;  %s634_s8 = int_to_ptr.vmem [resolvable:$true] %s284_s8 }
  0x12   : > { %s270_s20 = scalar_lea.sflag (!%p144_p10), [#allocation3], %s169_s4 }
  0x13   : > { %vm265_vm2 = vcmp.ne.s32.totalorder (!%p144_p10), %v264_v10, 1 }
  0x16   : > { %s173_s23 = scalar_select %p172_p11, %s535_s12, 1 }
  0x17   : > { %s465_s12 = scalar_lea.vmem %s634_s8, 128 }
  0x18   : > { %s384_s24 = sshll.u32 %s173_s23, 5  ;;  %s376_s28 = sshll.u32 %s173_s23, 3 }
  0x19   : > { %s183_s27 = scalar_lea.vmem %s680_s1, %s384_s24  ;;  %s175_s3 = scalar_lea.vmem %s679_s0, %s376_s28 }
  0x1a   : > { %v185_v2 = vld [vmem:[%s183_s27] sm:$0xff]  ;;  %v186_v3 = vld [vmem:[%s183_s27 + $0x8] sm:$0xff]  ;;  %v187_v4 = vld [vmem:[%s183_s27 + $0x10] sm:$0xff]  ;;  %p466_p12 = scmp.ne.s32.totalorder %s634_s8, %s465_s12  ;;  %s548_s23 = smov [#allocation2]  }
  0x1b   : > { %v402_v5 = vpack.c.bf16 %v186_v3, %v185_v2  ;;  %v188_v6 = vld [vmem:[%s183_s27 + $0x18] sm:$0xff]  ;;  %v184_v8 = vld [vmem:[%s175_s3] sm:$0xff]  ;;  %s469_s24 = sshll.u32 %s548_s23, 4  ;;  %s470_s24 = int_to_ptr.vmem [resolvable:$false] %s469_s24 }
  0x1c   : > { %v405_v7 = vpack.c.bf16 %v188_v6, %v187_v4  ;;  %p467_p13 = pnand %p466_p12, %p604_p4  ;;  %s471_s25 = scalar_lea.vmem %s470_s24, 256 }
  0x1d   : > { %403 = vmatpush3.bf16.msra.mxu0 %v402_v5  ;;  %p472_p1 = scmp.lt.s32.totalorder %s634_s8, %s470_s24  ;;  %p473_p2 = scmp.lt.s32.totalorder %s471_s25, %s465_s12 }
  0x1e   : > { %404 = vmatprep.subr.bf16.mxu0 %v545_v0  ;;  %p468_p0 = pneg %p467_p13 }
  0x1f   : > { %p474_p3 = por %p473_p2, %p472_p1 }
  0x21   : > { %406 = vmatpush3.bf16.msra.mxu0 %v405_v7  ;;  %p475_p5 = pnand %p474_p3, %p468_p0 }
  0x24   : > { %399 = vmatmul.mubr.msk.f32.vlgmr.msra.gmra.mrb[0].mxu0 %vm189_vm1, %v184_v8 }
  0xf7   : > { %v259_v11 = vpop.f32.mrb[0].mxu0 }
  0xf8   : > { %v266_v12 = vsel %vm265_vm2, %v259_v11, 0.0  ;;  %v400_v13 = vpop.f32.mrb[1].mxu0 }
  0xf9   : > { %268 = vst.msk [vmem:[%s171_s7] sm:$0xff] %vm267_vm3, %v266_v12 }
  0xfa   : > { %478 = shalt.err (!%p475_p5)
}
  0xfb   : > { %s479_s26 = scalar_lea.hbm %s632_s18, 128  ;;  %s483_s29 = scalar_lea.hbm %s681_s2, 256 }
  0xfc   : > { %p480_p6 = scmp.ne.s32.totalorder %s632_s18, %s479_s26  ;;  %p484_p10 = scmp.lt.u32.totalorder %s632_s18, %s681_s2 }
  0xfd   : > { %p485_p11 = scmp.lt.u32.totalorder %s483_s29, %s479_s26  ;;  %p487_p13 = scmp.lt.u32.totalorder %s479_s26, %s632_s18 }
  0xfe   : > { %p481_p7 = pnand %p480_p6, %p604_p4 }
  0xff   : > { %p486_p12 = por %p485_p11, %p484_p10 }
 0x100   : > { %p482_p9 = pneg %p481_p7 }
 0x101   : > { %p488_p0 = por %p487_p13, %p486_p12 }
 0x103   : > { %p489_p1 = pnand %p488_p0, %p482_p9 }
 0x105   : > { %492 = shalt.err (!%p489_p1)
}
 0x106   : > { %407 = dma.vmem_to_hbm [thread:$0]  (%p604_p4), %s634_s8, 128, %s632_s18, %s270_s20  }
 0x107 PF: > { %p413_p2 = scmp.ge.s32.totalorder %s543_s14, 2  ;;  %s296_s4 = sand.u32 1, %s523_s9  }
 0x108   : > { %s297_s5 = scalar_lea.sflag [#allocation3], %s296_s4 }
 0x109   : > { %p410_p3 = pnand %p413_p2, %p611_p8 }
 0x10b   : > { %518 = dma.done.wait (!%p410_p3), %s297_s5, 128  }
 0x10c   : > { %520 = vsyncadd (!%p410_p3), %s297_s5, 4294967168  ;;  %s15_s14 = sadd.s32 1, %s543_s14   ;;  %s684_s9 = smov %s527_s10 }
 0x10d   : > { %p12_p5 = scmp.ge.s32.totalorder %s15_s14, 4   ;;  %s685_s10 = smov %s531_s11 }
 0x10e   : > { %s686_s11 = smov %s617_s22  ;;  %s687_s12 = smov %s539_s13 }
 0x10f   : > { %s688_s13 = smov %s690_s17  ;;  %14 = sbr.rel (!%p12_p5) target bundleno = 4 (0x4), region = 66 }
 0x116   :  { %302 = vsyncpa [#allocation3], 1 }
 0x117   :  { %304 = vsyncpa [#allocation3 + $0x1], 1 }

</bundles_post_ra>
